<compile_context>
chip_gen: v7x
topology: tpu7x:2x2x1
jax: 0.10.0
libtpu: 0.0.40
codegen_flags: <defaults>
</compile_context>

<pallas_src>
import math

import jax
import jax.numpy as jnp
from jax import lax
from jax.experimental import pallas as pl
from jax.experimental.pallas import tpu as pltpu


def _round_up(x, m):
    return ((x + m - 1) // m) * m


def _net_kernel(x_ref, w_pre_ref, w_add_ref, o_ref, acc_ref):
    k = pl.program_id(2)

    @pl.when(k == 0)
    def _():
        acc_ref[...] = jnp.zeros_like(acc_ref)

    x = x_ref[...]                                   # (tm, tk)
    w_relu = jnp.maximum(w_pre_ref[...], 0.0)        # (tn, tk) tile, VPU only

    # x @ relu(w_pre).T  -- contract x dim-1 with w_pre dim-1 (trans-B style),
    # keeping the XLU transpose out of the hot path.
    acc_ref[...] += lax.dot_general(
        x, w_relu, (((1,), (1,)), ((), ())),
        preferred_element_type=jnp.float32)

    # x @ w_add
    acc_ref[...] += jnp.dot(x, w_add_ref[...],
                            preferred_element_type=jnp.float32)

    @pl.when(k == pl.num_programs(2) - 1)
    def _():
        o_ref[...] = acc_ref[...]


def net_forward(x, w_pre, w_add, *, tm_max=256, tn_max=512, tk_max=512):
    B, N = x.shape
    assert w_pre.shape == (N, N) and w_add.shape == (N, N)

    # Sublane/lane alignment: B -> multiple of 8, N -> multiple of 128 so the
    # output last dim is lane-dense (unmasked vst) and MXU/VPU lanes are full.
    br = _round_up(B, 8)
    nr = _round_up(N, 128)
    tm = br if br <= tm_max else tm_max
    tn = nr if nr <= tn_max else tn_max
    tk = nr if nr <= tk_max else tk_max
    bp = _round_up(br, tm)
    np_ = _round_up(nr, math.lcm(tn, tk))

    f32 = jnp.float32
    xp = jnp.pad(x.astype(f32), ((0, bp - B), (0, np_ - N)))
    wpp = jnp.pad(w_pre.astype(f32), ((0, np_ - N), (0, np_ - N)))
    wap = jnp.pad(w_add.astype(f32), ((0, np_ - N), (0, np_ - N)))

    grid = (bp // tm, np_ // tn, np_ // tk)

    cost = pl.CostEstimate(
        flops=2 * 2 * bp * np_ * np_,                 # two matmuls
        transcendentals=0,
        bytes_accessed=(2 * np_ * np_ + 2 * bp * np_) * 4,
    )

    out_p = pl.pallas_call(
        _net_kernel,
        out_shape=jax.ShapeDtypeStruct((bp, np_), f32),
        grid_spec=pltpu.PrefetchScalarGridSpec(
            num_scalar_prefetch=0,
            grid=grid,
            in_specs=[
                pl.BlockSpec((tm, tk), lambda i, j, k: (i, k)),   # x
                pl.BlockSpec((tn, tk), lambda i, j, k: (j, k)),   # w_pre (trans-B)
                pl.BlockSpec((tk, tn), lambda i, j, k: (k, j)),   # w_add
            ],
            out_specs=pl.BlockSpec((tm, tn), lambda i, j, k: (i, j)),
            scratch_shapes=[pltpu.VMEM((tm, tn), jnp.float32)],
        ),
        compiler_params=pltpu.CompilerParams(
            dimension_semantics=("parallel", "parallel", "arbitrary"),
        ),
        cost_estimate=cost,
    )(xp, wpp, wap)

    return out_p[:B, :N]


def net_reference(x, w_pre, w_add):
    w = jnp.maximum(w_pre.T, 0.0) + w_add
    return x @ w


if __name__ == "__main__":
    # Small shapes consistent with the module (torch.randn weights, default
    # size bumped to a non-trivial 32 features, batch=8).
    size = 32
    batch = 8

    key = jax.random.PRNGKey(0)
    k_x, k_pre, k_add = jax.random.split(key, 3)
    x = jax.random.normal(k_x, (batch, size), dtype=jnp.float32)
    w_pre = jax.random.normal(k_pre, (size, size), dtype=jnp.float32)
    w_add = jax.random.normal(k_add, (size, size), dtype=jnp.float32)

    out = net_forward(x, w_pre, w_add)
    out = jax.block_until_ready(out)

    ref = net_reference(x, w_pre, w_add)
    assert out.shape == (batch, size)
    assert jnp.allclose(out, ref, atol=1e-4, rtol=1e-5), "mismatch vs reference"

    print("KERNEL_OK")
</pallas_src>

<mosaic_0001>
module attributes {stable_mosaic.version = 11 : i64} {
  func.func @_net_kernel(%arg0: i32, %arg1: i32, %arg2: i32, %arg3: memref<8x128xf32, #tpu.memory_space<vmem>>, %arg4: memref<128x128xf32, #tpu.memory_space<vmem>>, %arg5: memref<128x128xf32, #tpu.memory_space<vmem>>, %arg6: memref<8x128xf32, #tpu.memory_space<vmem>>, %arg7: memref<8x128xf32, #tpu.memory_space<vmem>>) attributes {dimension_semantics = [#tpu.dimension_semantics<parallel>, #tpu.dimension_semantics<parallel>, #tpu.dimension_semantics<arbitrary>], iteration_bounds = array<i64: 1, 1, 1>, scalar_prefetch = 0 : i64, scratch_operands = 1 : i64, tpu.core_type = #tpu.core_type<tc>, window_params = [{transform_indices = @transform_0, window_bounds = array<i64: 8, 128>}, {transform_indices = @transform_1, window_bounds = array<i64: 128, 128>}, {transform_indices = @transform_2, window_bounds = array<i64: 128, 128>}, {transform_indices = @transform_3, window_bounds = array<i64: 8, 128>}]} {
    %c0_i32 = arith.constant 0 : i32
    %0 = arith.cmpi eq, %arg2, %c0_i32 : i32
    %1 = arith.extui %0 : i1 to i32
    %c0_i32_0 = arith.constant 0 : i32
    %2 = arith.cmpi ne, %1, %c0_i32_0 : i32
    scf.if %2 {
      %cst_18 = arith.constant 0.000000e+00 : f32
      %19 = vector.broadcast %cst_18 : f32 to vector<8x128xf32>
      %c0_19 = arith.constant 0 : index
      %c0_20 = arith.constant 0 : index
      %20 = vector.load %arg7[%c0_19, %c0_20] : memref<8x128xf32, #tpu.memory_space<vmem>>, vector<8x128xf32>
      tpu.vector_store %arg7[%c0_19, %c0_20], %19 {strides = array<i32>} : memref<8x128xf32, #tpu.memory_space<vmem>>, vector<8x128xf32>,
    } else {
    }
    %c0 = arith.constant 0 : index
    %c0_1 = arith.constant 0 : index
    %3 = vector.load %arg3[%c0, %c0_1] : memref<8x128xf32, #tpu.memory_space<vmem>>, vector<8x128xf32>
    %c0_2 = arith.constant 0 : index
    %c0_3 = arith.constant 0 : index
    %4 = vector.load %arg4[%c0_2, %c0_3] : memref<128x128xf32, #tpu.memory_space<vmem>>, vector<128x128xf32>
    %cst = arith.constant 0.000000e+00 : f32
    %5 = vector.broadcast %cst : f32 to vector<128x128xf32>
    %6 = arith.maximumf %4, %5 : vector<128x128xf32>
    %c0_4 = arith.constant 0 : index
    %c0_5 = arith.constant 0 : index
    %7 = vector.load %arg7[%c0_4, %c0_5] : memref<8x128xf32, #tpu.memory_space<vmem>>, vector<8x128xf32>
    %cst_6 = arith.constant dense<0.000000e+00> : vector<8x128xf32>
    %8 = tpu.matmul %3, %6, %cst_6 {dimension_numbers = #tpu.dot_dimension_numbers<[1], [1], [0], [0], [0, 0, 1, 0], [], []>} : vector<8x128xf32>, vector<128x128xf32>, vector<8x128xf32> -> vector<8x128xf32>
    %9 = arith.addf %7, %8 : vector<8x128xf32>
    %c0_7 = arith.constant 0 : index
    %c0_8 = arith.constant 0 : index
    %10 = vector.load %arg7[%c0_7, %c0_8] : memref<8x128xf32, #tpu.memory_space<vmem>>, vector<8x128xf32>
    tpu.vector_store %arg7[%c0_7, %c0_8], %9 {strides = array<i32>} : memref<8x128xf32, #tpu.memory_space<vmem>>, vector<8x128xf32>,
    %c0_9 = arith.constant 0 : index
    %c0_10 = arith.constant 0 : index
    %11 = vector.load %arg7[%c0_9, %c0_10] : memref<8x128xf32, #tpu.memory_space<vmem>>, vector<8x128xf32>
    %c0_11 = arith.constant 0 : index
    %c0_12 = arith.constant 0 : index
    %12 = vector.load %arg5[%c0_11, %c0_12] : memref<128x128xf32, #tpu.memory_space<vmem>>, vector<128x128xf32>
    %cst_13 = arith.constant dense<0.000000e+00> : vector<8x128xf32>
    %13 = tpu.matmul %3, %12, %cst_13 {dimension_numbers = #tpu.dot_dimension_numbers<[1], [0], [0], [1], [0, 0, 1, 1], [], []>} : vector<8x128xf32>, vector<128x128xf32>, vector<8x128xf32> -> vector<8x128xf32>
    %14 = arith.addf %11, %13 : vector<8x128xf32>
    %c0_14 = arith.constant 0 : index
    %c0_15 = arith.constant 0 : index
    %15 = vector.load %arg7[%c0_14, %c0_15] : memref<8x128xf32, #tpu.memory_space<vmem>>, vector<8x128xf32>
    tpu.vector_store %arg7[%c0_14, %c0_15], %14 {strides = array<i32>} : memref<8x128xf32, #tpu.memory_space<vmem>>, vector<8x128xf32>,
    %c0_i32_16 = arith.constant 0 : i32
    %16 = arith.cmpi eq, %arg2, %c0_i32_16 : i32
    %17 = arith.extui %16 : i1 to i32
    %c0_i32_17 = arith.constant 0 : i32
    %18 = arith.cmpi ne, %17, %c0_i32_17 : i32
    scf.if %18 {
      %c0_18 = arith.constant 0 : index
      %c0_19 = arith.constant 0 : index
      %19 = vector.load %arg7[%c0_18, %c0_19] : memref<8x128xf32, #tpu.memory_space<vmem>>, vector<8x128xf32>
      %c0_20 = arith.constant 0 : index
      %c0_21 = arith.constant 0 : index
      %20 = vector.load %arg6[%c0_20, %c0_21] : memref<8x128xf32, #tpu.memory_space<vmem>>, vector<8x128xf32>
      tpu.vector_store %arg6[%c0_20, %c0_21], %19 {strides = array<i32>} : memref<8x128xf32, #tpu.memory_space<vmem>>, vector<8x128xf32>,
    } else {
    }
    return
  }
  func.func @transform_0(%arg0: i32, %arg1: i32, %arg2: i32) -> (i32, i32) {
    %c0_i32 = arith.constant 0 : i32
    return %arg0, %arg2 : i32, i32
  }
  func.func @transform_1(%arg0: i32, %arg1: i32, %arg2: i32) -> (i32, i32) {
    %c0_i32 = arith.constant 0 : i32
    return %arg1, %arg2 : i32, i32
  }
  func.func @transform_2(%arg0: i32, %arg1: i32, %arg2: i32) -> (i32, i32) {
    %c0_i32 = arith.constant 0 : i32
    return %arg2, %arg1 : i32, i32
  }
  func.func @transform_3(%arg0: i32, %arg1: i32, %arg2: i32) -> (i32, i32) {
    %c0_i32 = arith.constant 0 : i32
    return %arg0, %arg1 : i32, i32
  }
}

</mosaic_0001>

<bundles_post_ra>
// kernel: tpu_custom_call.1
= control target key start
LH: loop header
LB: loop body
LE: loop exit
PB: predicated region body
PF: predicated region fallthrough
CT: control target
= control target key end

     0   :  { %8 = vsyncpa [#allocation4], 0  ;;  %s630_s0 = inlined_call_operand.hbm [shape: f32[8,128], index: 0, kind: input, shape index: {}]   ;;  %s631_s1 = inlined_call_operand.hbm [shape: f32[128,128], index: 1, kind: input, shape index: {}]   ;;  %s632_s2 = inlined_call_operand.hbm [shape: f32[128,128], index: 2, kind: input, shape index: {}]   ;;  %s633_s3 = inlined_call_operand.hbm [shape: f32[8,128], index: 3, kind: output, shape index: {}]  }
   0x1   :  { %9 = vsyncpa [#allocation7], 0 }
   0x2   :  { %10 = vsyncpa [#allocation5], 0  ;;  %s531_s12 = smov [#allocation6]   ;;  %s437_s16 = scalar_lea.hbm %s631_s1, 2048 }
   0x3   :  { %s26_s13 = sshll.u32 %s531_s12, 4  ;;  %p438_p0 = scmp.ne.s32.totalorder %s631_s1, %s437_s16  ;;  %s27_s13 = int_to_ptr.vmem [resolvable:$true] %s26_s13 }
   0x4   :  { %p441_p1 = scmp.lt.u32.totalorder %s437_s16, %s631_s1 }
   0x6   :  { %p443_p2 = pnand %p441_p1, %p438_p0 }
   0x8   :  { %446 = shalt.err (!%p443_p2)
}
   0x9   :  { %s447_s21 = scalar_lea.vmem %s27_s13, 2048  ;;  %p452_p4 = scmp.lt.s32.totalorder %s27_s13, %s27_s13 }
   0xa   :  { %p448_p3 = scmp.ne.s32.totalorder %s27_s13, %s447_s21  ;;  %p453_p5 = scmp.lt.s32.totalorder %s447_s21, %s447_s21 }
   0xc   :  { %p454_p6 = por %p453_p5, %p452_p4 }
   0xe   :  { %p455_p7 = pnand %p454_p6, %p448_p3 }
  0x10   :  { %458 = shalt.err (!%p455_p7)
}
  0x11   :  { %s532_s22 = smov 128   ;;  %s533_s23 = smov 8  }
  0x12   :  { %32 = dma.hbm_to_vmem [thread:$0]  %s631_s1, 2048, %s27_s13, [#allocation7], %s532_s22, %s532_s22, %s533_s23  }
  0x13   :  { %s534_s26 = smov [#allocation3]   ;;  %s535_s28 = smov [#allocation8]  }
  0x14   :  { %s17_s27 = sshll.u32 %s534_s26, 4  ;;  %s38_s29 = sshll.u32 %s535_s28, 4  ;;  %s18_s27 = int_to_ptr.vmem [resolvable:$true] %s17_s27  ;;  %s39_s29 = int_to_ptr.vmem [resolvable:$true] %s38_s29 }
  0x15   :  { %s459_s5 = scalar_lea.hbm %s630_s0, 128 }
  0x16   :  { %p460_p8 = scmp.ne.s32.totalorder %s630_s0, %s459_s5  ;;  %p463_p9 = scmp.lt.u32.totalorder %s459_s5, %s630_s0 }
  0x18   :  { %p465_p10 = pnand %p463_p9, %p460_p8 }
  0x1a   :  { %468 = shalt.err (!%p465_p10)
}
  0x1b   :  { %s469_s1 = scalar_lea.vmem %s18_s27, 128  ;;  %p474_p12 = scmp.lt.s32.totalorder %s18_s27, %s18_s27 }
  0x1c   :  { %p470_p11 = scmp.ne.s32.totalorder %s18_s27, %s469_s1  ;;  %p475_p13 = scmp.lt.s32.totalorder %s469_s1, %s469_s1 }
  0x1e   :  { %p476_p0 = por %p475_p13, %p474_p12 }
  0x20   :  { %p477_p1 = pnand %p476_p0, %p470_p11 }
  0x22   :  { %480 = shalt.err (!%p477_p1)
}
  0x23   :  { %20 = dma.hbm_to_vmem [thread:$0]  %s630_s0, 128, %s18_s27, [#allocation4]  }
  0x24   :  { %s481_s14 = scalar_lea.hbm %s632_s2, 2048 }
  0x25   :  { %p482_p2 = scmp.ne.s32.totalorder %s632_s2, %s481_s14  ;;  %p485_p3 = scmp.lt.u32.totalorder %s481_s14, %s632_s2 }
  0x27   :  { %p487_p4 = pnand %p485_p3, %p482_p2 }
  0x29   :  { %490 = shalt.err (!%p487_p4)
}
  0x2a   :  { %s491_s19 = scalar_lea.vmem %s39_s29, 2048  ;;  %p496_p6 = scmp.lt.s32.totalorder %s39_s29, %s39_s29 }
  0x2b   :  { %p492_p5 = scmp.ne.s32.totalorder %s39_s29, %s491_s19  ;;  %p497_p7 = scmp.lt.s32.totalorder %s491_s19, %s491_s19 }
  0x2d   :  { %p498_p8 = por %p497_p7, %p496_p6 }
  0x2f   :  { %p499_p9 = pnand %p498_p8, %p492_p5 }
  0x31   :  { %502 = shalt.err (!%p499_p9)
}
  0x32   :  { %44 = dma.hbm_to_vmem [thread:$0]  %s632_s2, 2048, %s39_s29, [#allocation7], %s532_s22, %s532_s22, %s533_s23  }
  0x33   :  { %525 = dma.done.wait [#allocation4], 128  }
  0x34   :  { %526 = vsyncadd [#allocation4], 4294967168 }
  0x35   :  { %527 = dma.done.wait [#allocation7], 4096  }
  0x36   :  { %528 = vsyncadd [#allocation7], 4294963200  ;;  %v536_v0 = vmov 0.0|0.0   ;;  %vm537_vm0 = vmmov 0   ;;  %v538_v1 = vmov 0.0   ;;  %v60_v2 = vld [vmem:[#allocation6] sm:$0xff] }
  0x37   :  { %379 = vmatprep.subr.bf16.mxu1 %v536_v0  ;;  %403 = vmatprep.subr.bf16.mxu0 %v536_v0  ;;  %v61_v3 = vld [vmem:[#allocation6 + $0x8] sm:$0xff]  ;;  %v76_v4 = vmax.f32 %v60_v2, 0.0  ;;  %v62_v6 = vld [vmem:[#allocation6 + $0x10] sm:$0xff]  ;;  %v63_v7 = vld [vmem:[#allocation6 + $0x18] sm:$0xff]  ;;  %s539_s2 = smov [#allocation9]  }
  0x38   :  { %376 = vmatprep.mubr.msk.f32.mxu0 %vm537_vm0, %v538_v1  ;;  %341 = vmatprep.mubr.msk.f32.mxu1 %vm537_vm0, %v538_v1  ;;  %v77_v5 = vmax.f32 %v61_v3, 0.0  ;;  %v166_v8 = vld [vmem:[#allocation8] sm:$0xff]  ;;  %v167_v10 = vld [vmem:[#allocation8 + $0x8] sm:$0xff]  ;;  %v168_v12 = vld [vmem:[#allocation8 + $0x10] sm:$0xff]  ;;  %v78_v14 = vmax.f32 %v62_v6, 0.0  ;;  %v79_v15 = vmax.f32 %v63_v7, 0.0 }
  0x39   :  { %v404_v11 = vpack.c.bf16 %v167_v10, %v166_v8  ;;  %v169_v13 = vld [vmem:[#allocation8 + $0x18] sm:$0xff]  ;;  %v170_v17 = vld [vmem:[#allocation8 + $0x20] sm:$0xff]  ;;  %v171_v18 = vld [vmem:[#allocation8 + $0x28] sm:$0xff]  ;;  %s265_s21 = sshll.u32 %s539_s2, 4  ;;  %s266_s21 = int_to_ptr.vmem [resolvable:$true] %s265_s21 }
  0x3a   :  { %v380_v9 = vpack.c.bf16 %v77_v5, %v76_v4  ;;  %v407_v16 = vpack.c.bf16 %v169_v13, %v168_v12  ;;  %v383_v19 = vpack.c.bf16 %v79_v15, %v78_v14  ;;  %v64_v20 = vld [vmem:[#allocation6 + $0x20] sm:$0xff]  ;;  %v65_v21 = vld [vmem:[#allocation6 + $0x28] sm:$0xff]  ;;  %v410_v22 = vpack.c.bf16 %v171_v18, %v170_v17  ;;  %v172_v23 = vld [vmem:[#allocation8 + $0x30] sm:$0xff]  ;;  %s503_s22 = scalar_lea.vmem %s266_s21, 128  ;;  %p508_p11 = scmp.lt.s32.totalorder %s266_s21, %s266_s21 }
  0x3b   :  { %405 = vmatpush3.bf16.msra.mxu0 %v404_v11  ;;  %v173_v24 = vld [vmem:[#allocation8 + $0x38] sm:$0xff]  ;;  %v80_v25 = vmax.f32 %v64_v20, 0.0  ;;  %v81_v26 = vmax.f32 %v65_v21, 0.0  ;;  %v174_v28 = vld [vmem:[#allocation8 + $0x40] sm:$0xff]  ;;  %v175_v29 = vld [vmem:[#allocation8 + $0x48] sm:$0xff]  ;;  %p504_p10 = scmp.ne.s32.totalorder %s266_s21, %s503_s22  ;;  %p509_p12 = scmp.lt.s32.totalorder %s503_s22, %s503_s22 }
  0x3c   :  { %381 = vmatpush3.bf16.xpose.msra.mxu1 %v380_v9  ;;  %406 = vmatprep.subr.bf16.mxu0 %v536_v0  ;;  %v413_v27 = vpack.c.bf16 %v173_v24, %v172_v23  ;;  %v66_v31 = vld [vmem:[#allocation6 + $0x30] sm:$0xff]  ;;  %v67_v32 = vld [vmem:[#allocation6 + $0x38] sm:$0xff]  ;;  %v416_v33 = vpack.c.bf16 %v175_v29, %v174_v28  ;;  %v178_v39 = vld [vmem:[#allocation8 + $0x60] sm:$0xff] }
  0x3d   :  { %382 = vmatprep.subr.bf16.mxu1 %v536_v0  ;;  %v386_v30 = vpack.c.bf16 %v81_v26, %v80_v25  ;;  %v176_v34 = vld [vmem:[#allocation8 + $0x50] sm:$0xff]  ;;  %v177_v35 = vld [vmem:[#allocation8 + $0x58] sm:$0xff]  ;;  %v82_v36 = vmax.f32 %v66_v31, 0.0  ;;  %v83_v37 = vmax.f32 %v67_v32, 0.0  ;;  %v179_v40 = vld [vmem:[#allocation8 + $0x68] sm:$0xff]  ;;  %p510_p13 = por %p509_p12, %p508_p11 }
  0x3e   :  { %v419_v38 = vpack.c.bf16 %v177_v35, %v176_v34  ;;  %v68_v42 = vld [vmem:[#allocation6 + $0x40] sm:$0xff]  ;;  %v69_v43 = vld [vmem:[#allocation6 + $0x48] sm:$0xff]  ;;  %v422_v44 = vpack.c.bf16 %v179_v40, %v178_v39  ;;  %v180_v45 = vld [vmem:[#allocation8 + $0x70] sm:$0xff] }
  0x3f   :  { %408 = vmatpush3.bf16.msra.mxu0 %v407_v16  ;;  %v389_v41 = vpack.c.bf16 %v83_v37, %v82_v36  ;;  %v181_v46 = vld [vmem:[#allocation8 + $0x78] sm:$0xff]  ;;  %v84_v47 = vmax.f32 %v68_v42, 0.0  ;;  %v85_v48 = vmax.f32 %v69_v43, 0.0  ;;  %v70_v51 = vld [vmem:[#allocation6 + $0x50] sm:$0xff]  ;;  %v72_v57 = vld [vmem:[#allocation6 + $0x60] sm:$0xff]  ;;  %p511_p0 = pnand %p510_p13, %p504_p10 }
  0x40   :  { %409 = vmatprep.subr.bf16.mxu0 %v536_v0  ;;  %v425_v49 = vpack.c.bf16 %v181_v46, %v180_v45  ;;  %v71_v52 = vld [vmem:[#allocation6 + $0x58] sm:$0xff]  ;;  %v86_v54 = vmax.f32 %v70_v51, 0.0  ;;  %v73_v58 = vld [vmem:[#allocation6 + $0x68] sm:$0xff]  ;;  %v88_v59 = vmax.f32 %v72_v57, 0.0  ;;  %v74_v62 = vld [vmem:[#allocation6 + $0x70] sm:$0xff] }
  0x41   :  { %v392_v50 = vpack.c.bf16 %v85_v48, %v84_v47  ;;  %v59_v53 = vld [vmem:[#allocation3] sm:$0xff]  ;;  %v87_v55 = vmax.f32 %v71_v52, 0.0  ;;  %v89_v60 = vmax.f32 %v73_v58, 0.0  ;;  %v90_v1 = vmax.f32 %v74_v62, 0.0 }
  0x42   :  { %v75_v63 = vld [vmem:[#allocation6 + $0x78] sm:$0xff] }
  0x43   :  { %411 = vmatpush3.bf16.msra.mxu0 %v410_v22  ;;  %v395_v56 = vpack.c.bf16 %v87_v55, %v86_v54  ;;  %v398_v61 = vpack.c.bf16 %v89_v60, %v88_v59  ;;  %v91_v2 = vmax.f32 %v75_v63, 0.0 }
  0x44   :  { %384 = vmatpush3.bf16.xpose.msra.mxu1 %v383_v19  ;;  %412 = vmatprep.subr.bf16.mxu0 %v536_v0 }
  0x45   :  { %385 = vmatprep.subr.bf16.mxu1 %v536_v0  ;;  %v401_v3 = vpack.c.bf16 %v91_v2, %v90_v1 }
  0x47   :  { %414 = vmatpush3.bf16.msra.mxu0 %v413_v27 }
  0x48   :  { %415 = vmatprep.subr.bf16.mxu0 %v536_v0 }
  0x4b   :  { %417 = vmatpush3.bf16.msra.mxu0 %v416_v33 }
  0x4c   :  { %387 = vmatpush3.bf16.xpose.msra.mxu1 %v386_v30  ;;  %418 = vmatprep.subr.bf16.mxu0 %v536_v0 }
  0x4d   :  { %388 = vmatprep.subr.bf16.mxu1 %v536_v0 }
  0x4f   :  { %420 = vmatpush3.bf16.msra.mxu0 %v419_v38 }
  0x50   :  { %421 = vmatprep.subr.bf16.mxu0 %v536_v0 }
  0x53   :  { %423 = vmatpush3.bf16.msra.mxu0 %v422_v44 }
  0x54   :  { %390 = vmatpush3.bf16.xpose.msra.mxu1 %v389_v41  ;;  %424 = vmatprep.subr.bf16.mxu0 %v536_v0 }
  0x55   :  { %391 = vmatprep.subr.bf16.mxu1 %v536_v0 }
  0x57   :  { %426 = vmatpush3.bf16.msra.mxu0 %v425_v49 }
  0x5a   :  { %377 = vmatmul.mubr.f32.vlgmr.msra.gmra.mrb[0].mxu0 %v59_v53 }
  0x5c   :  { %393 = vmatpush3.bf16.xpose.msra.mxu1 %v392_v50 }
  0x5d   :  { %394 = vmatprep.subr.bf16.mxu1 %v536_v0 }
  0x64   :  { %396 = vmatpush3.bf16.xpose.msra.mxu1 %v395_v56 }
  0x65   :  { %397 = vmatprep.subr.bf16.mxu1 %v536_v0 }
  0x6c   :  { %399 = vmatpush3.bf16.xpose.msra.mxu1 %v398_v61 }
  0x6d   :  { %400 = vmatprep.subr.bf16.mxu1 %v536_v0 }
  0x74   :  { %402 = vmatpush3.bf16.xpose.msra.mxu1 %v401_v3 }
  0x7b   :  { %342 = vmatmul.mubr.f32.vlgmr.msra.gmra.mrb[0].mxu1 %v59_v53 }
 0x12d   :  { %v248_v4 = vpop.f32.mrb[0].mxu0 }
 0x12e   :  { %v378_v5 = vpop.f32.mrb[1].mxu0 }
 0x14e   :  { %v159_v6 = vpop.f32.mrb[0].mxu1 }
 0x14f   :  { %v252_v7 = vadd.f32 %v248_v4, %v159_v6  ;;  %v343_v8 = vpop.f32.mrb[1].mxu1 }
 0x151   :  { %258 = vst [vmem:[#allocation9] sm:$0xff] %v252_v7 }
 0x152   :  { %514 = shalt.err (!%p511_p0)
}
 0x153   :  { %s515_s25 = scalar_lea.hbm %s633_s3, 128 }
 0x154   :  { %p516_p1 = scmp.ne.s32.totalorder %s633_s3, %s515_s25  ;;  %p519_p2 = scmp.lt.u32.totalorder %s515_s25, %s633_s3 }
 0x156   :  { %p521_p3 = pnand %p519_p2, %p516_p1 }
 0x158   :  { %524 = shalt.err (!%p521_p3)
}
 0x159   :  { %268 = dma.vmem_to_hbm [thread:$0]  %s266_s21, 128, %s633_s3, [#allocation5]  }
 0x15a   :  { %529 = dma.done.wait [#allocation5], 128  }
 0x15b   :  { %530 = vsyncadd [#allocation5], 4294967168 }
 0x15c   :  { %272 = vsyncpa [#allocation4], 1 }
 0x15d   :  { %273 = vsyncpa [#allocation7], 1 }
 0x15e   :  { %274 = vsyncpa [#allocation5], 1 }

</bundles_post_ra>
